<compile_context>
chip_gen: v7x
topology: tpu7x:2x2x1
jax: 0.10.0
libtpu: 0.0.40
codegen_flags: <defaults>
</compile_context>

<pallas_src>
import functools

import jax
import jax.numpy as jnp
from jax import lax
from jax.experimental import pallas as pl
from jax.experimental.pallas import tpu as pltpu


def _temporal_block_kernel(*refs, L_tile, K, dil, pad, identity_res):
    """One (batch, time-tile) grid step.

    refs = (x, w1s, b1, w2s, b2, [wd, bd], out, [xext_scratch])
      x    : (1, C_in, L_tile)        bf16  current time tile (NCL)
      w1s  : (C_out, K*C_in)          bf16  conv1 weight, taps stacked
      b1   : (C_out, 1)               f32
      w2s  : (C_out, K*C_out)         bf16  conv2 weight, taps stacked
      b2   : (C_out, 1)               f32
      wd   : (C_out, C_in)            bf16  1x1 downsample (only if needed)
      bd   : (C_out, 1)               f32
      out  : (1, C_out, L_tile)       f32
      xext : (C_in, L_tile + 2*pad)   bf16  VMEM scratch: [causal halo | tile]
    """
    if identity_res:
        x_ref, w1_ref, b1_ref, w2_ref, b2_ref, o_ref = refs[:6]
        scratch = refs[6:]
        wd_ref = bd_ref = None
    else:
        x_ref, w1_ref, b1_ref, w2_ref, b2_ref, wd_ref, bd_ref, o_ref = refs[:8]
        scratch = refs[8:]

    halo = 2 * pad            # causal x history: pad (conv1) + pad (conv2's h1)
    Lh1 = L_tile + pad        # h1 columns needed (includes conv2's halo)
    is_first_tile = pl.program_id(1) == 0

    x_cur = x_ref[0]          # (C_in, L_tile) bf16

    if pad > 0:
        xext_ref = scratch[0]

        # First time tile of every batch element: causal history is zeros.
        @pl.when(is_first_tile)
        def _():
            xext_ref[:, 0:halo] = jnp.zeros(
                (xext_ref.shape[0], halo), dtype=xext_ref.dtype)

        xext_ref[:, halo:] = x_cur
        x_ext = xext_ref[...]                       # (C_in, L_tile + 2*pad)
        # Carry the trailing `halo` columns to the next (sequential) time tile.
        xext_ref[:, 0:halo] = x_ext[:, L_tile:]
    else:                                           # kernel_size == 1 (pad == 0)
        x_ext = x_cur

    # ---- conv1: fold the K dilated taps into one bf16 MXU matmul ------------
    if K > 1:
        x1 = jnp.concatenate(
            [x_ext[:, k * dil:k * dil + Lh1] for k in range(K)], axis=0)
    else:
        x1 = x_ext[:, :Lh1]
    h1 = jnp.dot(w1_ref[...], x1, preferred_element_type=jnp.float32)
    h1 = jnp.maximum(h1 + b1_ref[...], 0.0)          # (C_out, L_tile + pad) f32

    if pad > 0:
        # The first `pad` columns of h1 are conv2's causal halo (times
        # t < tile_start).  On the FIRST tile those times are t < 0, where the
        # reference zero-pads h1 before conv2 — so the bias+ReLU value must be
        # masked out there.  On later tiles the halo is real (recomputed) data.
        col = lax.broadcasted_iota(jnp.int32, h1.shape, 1)
        h1 = jnp.where(jnp.logical_and(is_first_tile, col < pad), 0.0, h1)

    # dropout1: identity (eval mode)
    h1 = h1.astype(jnp.bfloat16)

    # ---- conv2: same fold over h1 (its causal halo was recomputed above) ----
    if K > 1:
        x2 = jnp.concatenate(
            [h1[:, k * dil:k * dil + L_tile] for k in range(K)], axis=0)
    else:
        x2 = h1[:, :L_tile]
    h2 = jnp.dot(w2_ref[...], x2, preferred_element_type=jnp.float32)
    h2 = jnp.maximum(h2 + b2_ref[...], 0.0)          # (C_out, L_tile) f32
    # dropout2: identity (eval mode)

    # ---- residual (identity or 1x1 conv) + final ReLU ------------------------
    if identity_res:
        res = x_cur.astype(jnp.float32)
    else:
        res = jnp.dot(wd_ref[...], x_cur,
                      preferred_element_type=jnp.float32) + bd_ref[...]
    o_ref[0] = jnp.maximum(h2 + res, 0.0).astype(o_ref.dtype)


def temporal_block_forward(x_ncl, params, *, kernel_size, dilation,
                           time_tile=512):
    """x_ncl: (B, C_in, L) like the PyTorch module.  Returns (B, C_out, L) f32.

    `time_tile` should be a multiple of 128; sweep ~512-2048 on v5e/v6e and
    roughly half that on v7x (64 MiB VMEM).  Raise
    pltpu.CompilerParams(vmem_limit_bytes=...) for very large tiles.
    """
    B, C_in, L = x_ncl.shape
    K = kernel_size
    pad = (K - 1) * dilation
    w1s, b1, w2s, b2, wd, bd = params           # stacked bf16 matmul layout
    C_out = w1s.shape[0]
    identity_res = wd is None

    # Lane-dense time tiles when they divide L, else one whole-sequence tile.
    if time_tile % 128 == 0 and L % time_tile == 0:
        L_tile = time_tile
    else:
        L_tile = L          # TODO(synk): masked edge tiles for general L
    n_t = L // L_tile

    # Activations travel as bf16 (native MXU rate, half the HBM traffic).  In a
    # full TCN stack the previous block would already hand over bf16.
    x_bf16 = x_ncl.astype(jnp.bfloat16)

    kernel = functools.partial(
        _temporal_block_kernel,
        L_tile=L_tile, K=K, dil=dilation, pad=pad, identity_res=identity_res)

    in_specs = [
        pl.BlockSpec((1, C_in, L_tile), lambda b, i: (b, 0, i)),
        pl.BlockSpec((C_out, K * C_in), lambda b, i: (0, 0)),
        pl.BlockSpec((C_out, 1), lambda b, i: (0, 0)),
        pl.BlockSpec((C_out, K * C_out), lambda b, i: (0, 0)),
        pl.BlockSpec((C_out, 1), lambda b, i: (0, 0)),
    ]
    args = [x_bf16, w1s, b1, w2s, b2]
    if not identity_res:
        in_specs += [pl.BlockSpec((C_out, C_in), lambda b, i: (0, 0)),
                     pl.BlockSpec((C_out, 1), lambda b, i: (0, 0))]
        args += [wd, bd]

    scratch_shapes = []
    if pad > 0:
        scratch_shapes.append(
            pltpu.VMEM((C_in, L_tile + 2 * pad), jnp.bfloat16))

    out = pl.pallas_call(
        kernel,
        out_shape=jax.ShapeDtypeStruct((B, C_out, L), jnp.float32),
        grid_spec=pltpu.PrefetchScalarGridSpec(
            num_scalar_prefetch=0,
            grid=(B, n_t),
            in_specs=in_specs,
            out_specs=pl.BlockSpec((1, C_out, L_tile), lambda b, i: (b, 0, i)),
            scratch_shapes=scratch_shapes,
        ),
        # Batch is megacore-parallel; time carries the causal halo in scratch,
        # so it must stay sequential ("arbitrary").
        compiler_params=pltpu.CompilerParams(
            dimension_semantics=("parallel", "arbitrary")),
    )(*args)
    return out                                    # already NCL: no transpose


def _weight_norm(v, g):
    """PyTorch weight_norm on a Conv1d weight (C_out, C_in, K), dim=0."""
    norm = jnp.sqrt(jnp.sum(v ** 2, axis=(1, 2), keepdims=True))
    return g[:, None, None] * v / norm


def make_params(key, n_inputs, n_outputs, kernel_size):
    """Deterministic synthetic parameters matching the module's __init__ shapes.

    Returns (kernel_params, torch_params): bf16 stacked-matmul layout for the
    Pallas kernel, f32 PyTorch-layout tensors for the pure-JAX reference.
    """
    ks = jax.random.split(key, 8)
    v1 = 0.01 * jax.random.normal(ks[0], (n_outputs, n_inputs, kernel_size), jnp.float32)
    g1 = jax.random.uniform(ks[1], (n_outputs,), jnp.float32, 0.5, 1.5)
    v2 = 0.01 * jax.random.normal(ks[2], (n_outputs, n_outputs, kernel_size), jnp.float32)
    g2 = jax.random.uniform(ks[3], (n_outputs,), jnp.float32, 0.5, 1.5)
    b1 = 0.1 * jax.random.normal(ks[4], (n_outputs,), jnp.float32)
    b2 = 0.1 * jax.random.normal(ks[5], (n_outputs,), jnp.float32)

    w1 = _weight_norm(v1, g1)                    # (C_out, C_in, K)
    w2 = _weight_norm(v2, g2)                    # (C_out, C_out, K)

    if n_inputs != n_outputs:
        wd = 0.01 * jax.random.normal(ks[6], (n_outputs, n_inputs, 1), jnp.float32)
        bd = 0.1 * jax.random.normal(ks[7], (n_outputs,), jnp.float32)
    else:
        wd = None                                # downsample is None -> identity
        bd = None

    # Stacked per-tap matmul layout: W_s[o, k*C + c] = W[o, c, k].
    w1s = jnp.transpose(w1, (0, 2, 1)).reshape(n_outputs, kernel_size * n_inputs)
    w2s = jnp.transpose(w2, (0, 2, 1)).reshape(n_outputs, kernel_size * n_outputs)
    kernel_params = (
        w1s.astype(jnp.bfloat16), b1.reshape(-1, 1),
        w2s.astype(jnp.bfloat16), b2.reshape(-1, 1),
        None if wd is None else wd[:, :, 0].astype(jnp.bfloat16),
        None if bd is None else bd.reshape(-1, 1),
    )
    torch_params = (w1, b1, w2, b2, wd, bd)
    return kernel_params, torch_params


def reference_forward(x, torch_params, *, kernel_size, dilation):
    """Pure-JAX reference mirroring the PyTorch module (NCL layout), using the
    same bf16-operand / f32-accumulation precision as the kernel."""
    w1, b1, w2, b2, wd, bd = torch_params
    pad = (kernel_size - 1) * dilation
    dn = ('NCH', 'OIH', 'NCH')

    def conv(inp, w, b, p, d):
        y = lax.conv_general_dilated(
            inp, w.astype(jnp.bfloat16), window_strides=(1,),
            padding=[(p, p)], rhs_dilation=(d,), dimension_numbers=dn,
            preferred_element_type=jnp.float32)
        return y + b[None, :, None]

    def chomp(y):
        return y[:, :, :-pad] if pad > 0 else y

    xb = x.astype(jnp.bfloat16)
    h = jnp.maximum(chomp(conv(xb, w1, b1, pad, dilation)), 0.0)   # conv1+chomp+relu
    h = h.astype(jnp.bfloat16)                                     # dropout = id
    h = jnp.maximum(chomp(conv(h, w2, b2, pad, dilation)), 0.0)    # conv2+chomp+relu
    res = xb.astype(jnp.float32) if wd is None else conv(xb, wd, bd, 0, 1)
    return jnp.maximum(h + res, 0.0)


def _run_case(name, *, B, C_in, C_out, L, K, dil, time_tile, seed):
    key = jax.random.fold_in(jax.random.PRNGKey(0), seed)
    kx, kp = jax.random.split(key)
    x = jax.random.normal(kx, (B, C_in, L), jnp.float32)
    kernel_params, torch_params = make_params(kp, C_in, C_out, K)

    out = temporal_block_forward(x, kernel_params, kernel_size=K,
                                 dilation=dil, time_tile=time_tile)
    out = jax.block_until_ready(out)
    ref = reference_forward(x, torch_params, kernel_size=K, dilation=dil)

    assert out.shape == (B, C_out, L), (name, out.shape)
    err = float(jnp.max(jnp.abs(out - ref)))
    assert err < 2e-3, (name, err)
    return err


if __name__ == "__main__":
    # 1) time-tiled (two 128-wide tiles) + halo carry + 1x1 downsample residual
    _run_case("tiled_downsample", B=2, C_in=16, C_out=32, L=256, K=3, dil=2,
              time_tile=128, seed=1)
    # 2) single whole-sequence tile, identity residual (no downsample matmul)
    _run_case("identity_residual", B=2, C_in=16, C_out=16, L=16, K=3, dil=1,
              time_tile=128, seed=2)
    # 3) kernel_size=1 edge case (pad == 0 -> no halo scratch, no chomp)
    _run_case("kernel_size_1", B=1, C_in=16, C_out=16, L=16, K=1, dil=1,
              time_tile=128, seed=3)
    print("KERNEL_OK")
</pallas_src>

<mosaic_0001>
module attributes {stable_mosaic.version = 11 : i64} {
  func.func @_temporal_block_kernel(%arg0: i32, %arg1: i32, %arg2: memref<1x16x128xbf16, #tpu.memory_space<vmem>>, %arg3: memref<32x48xbf16, #tpu.memory_space<vmem>>, %arg4: memref<32x1xf32, #tpu.memory_space<vmem>>, %arg5: memref<32x96xbf16, #tpu.memory_space<vmem>>, %arg6: memref<32x1xf32, #tpu.memory_space<vmem>>, %arg7: memref<32x16xbf16, #tpu.memory_space<vmem>>, %arg8: memref<32x1xf32, #tpu.memory_space<vmem>>, %arg9: memref<1x32x128xf32, #tpu.memory_space<vmem>>, %arg10: memref<16x136xbf16, #tpu.memory_space<vmem>>) attributes {dimension_semantics = [#tpu.dimension_semantics<parallel>, #tpu.dimension_semantics<arbitrary>], iteration_bounds = array<i64: 2, 2>, scalar_prefetch = 0 : i64, scratch_operands = 1 : i64, tpu.core_type = #tpu.core_type<tc>, window_params = [{transform_indices = @transform_0, window_bounds = array<i64: 1, 16, 128>}, {pipeline_mode = #tpu.pipeline_mode<synchronous>, transform_indices = @transform_1, window_bounds = array<i64: 32, 48>}, {pipeline_mode = #tpu.pipeline_mode<synchronous>, transform_indices = @transform_2, window_bounds = array<i64: 32, 1>}, {pipeline_mode = #tpu.pipeline_mode<synchronous>, transform_indices = @transform_3, window_bounds = array<i64: 32, 96>}, {pipeline_mode = #tpu.pipeline_mode<synchronous>, transform_indices = @transform_4, window_bounds = array<i64: 32, 1>}, {pipeline_mode = #tpu.pipeline_mode<synchronous>, transform_indices = @transform_5, window_bounds = array<i64: 32, 16>}, {pipeline_mode = #tpu.pipeline_mode<synchronous>, transform_indices = @transform_6, window_bounds = array<i64: 32, 1>}, {transform_indices = @transform_7, window_bounds = array<i64: 1, 32, 128>}]} {
    %c0_i32 = arith.constant 0 : i32
    %0 = arith.cmpi eq, %arg1, %c0_i32 : i32
    %c0 = arith.constant 0 : index
    %c0_0 = arith.constant 0 : index
    %c0_1 = arith.constant 0 : index
    %1 = vector.load %arg2[%c0, %c0_0, %c0_1] : memref<1x16x128xbf16, #tpu.memory_space<vmem>>, vector<1x16x128xbf16>
    %2 = vector.shape_cast %1 : vector<1x16x128xbf16> to vector<16x128xbf16>
    %3 = arith.extui %0 : i1 to i32
    %c0_i32_2 = arith.constant 0 : i32
    %4 = arith.cmpi ne, %3, %c0_i32_2 : i32
    scf.if %4 {
      %cst_29 = arith.constant 0.000000e+00 : bf16
      %50 = vector.broadcast %cst_29 : bf16 to vector<16x8xbf16>
      %c0_30 = arith.constant 0 : index
      %c0_31 = arith.constant 0 : index
      %51 = vector.load %arg10[%c0_30, %c0_31] : memref<16x136xbf16, #tpu.memory_space<vmem>>, vector<16x8xbf16>
      tpu.vector_store %arg10[%c0_30, %c0_31], %50 {strides = array<i32>} : memref<16x136xbf16, #tpu.memory_space<vmem>>, vector<16x8xbf16>,
    } else {
    }
    %c0_3 = arith.constant 0 : index
    %c8 = arith.constant 8 : index
    %5 = vector.load %arg10[%c0_3, %c8] : memref<16x136xbf16, #tpu.memory_space<vmem>>, vector<16x128xbf16>
    tpu.vector_store %arg10[%c0_3, %c8], %2 {strides = array<i32>} : memref<16x136xbf16, #tpu.memory_space<vmem>>, vector<16x128xbf16>,
    %c0_4 = arith.constant 0 : index
    %c0_5 = arith.constant 0 : index
    %6 = vector.load %arg10[%c0_4, %c0_5] : memref<16x136xbf16, #tpu.memory_space<vmem>>, vector<16x136xbf16>
    %7 = vector.extract_strided_slice %6 {offsets = [0, 128], sizes = [16, 8], strides = [1, 1]} : vector<16x136xbf16> to vector<16x8xbf16>
    %c0_6 = arith.constant 0 : index
    %c0_7 = arith.constant 0 : index
    %8 = vector.load %arg10[%c0_6, %c0_7] : memref<16x136xbf16, #tpu.memory_space<vmem>>, vector<16x8xbf16>
    tpu.vector_store %arg10[%c0_6, %c0_7], %7 {strides = array<i32>} : memref<16x136xbf16, #tpu.memory_space<vmem>>, vector<16x8xbf16>,
    %9 = vector.extract_strided_slice %6 {offsets = [0, 0], sizes = [16, 132], strides = [1, 1]} : vector<16x136xbf16> to vector<16x132xbf16>
    %10 = vector.extract_strided_slice %6 {offsets = [0, 2], sizes = [16, 132], strides = [1, 1]} : vector<16x136xbf16> to vector<16x132xbf16>
    %11 = vector.extract_strided_slice %6 {offsets = [0, 4], sizes = [16, 132], strides = [1, 1]} : vector<16x136xbf16> to vector<16x132xbf16>
    %12 = tpu.concatenate %9, %10, %11 in 0 : vector<16x132xbf16>, vector<16x132xbf16>, vector<16x132xbf16> -> vector<48x132xbf16>
    %c0_8 = arith.constant 0 : index
    %c0_9 = arith.constant 0 : index
    %13 = vector.load %arg3[%c0_8, %c0_9] : memref<32x48xbf16, #tpu.memory_space<vmem>>, vector<32x48xbf16>
    %cst = arith.constant dense<0.000000e+00> : vector<32x132xf32>
    %14 = tpu.matmul %13, %12, %cst {dimension_numbers = #tpu.dot_dimension_numbers<[1], [0], [0], [1], [0, 0, 1, 1], [], []>} : vector<32x48xbf16>, vector<48x132xbf16>, vector<32x132xf32> -> vector<32x132xf32>
    %c0_10 = arith.constant 0 : index
    %c0_11 = arith.constant 0 : index
    %15 = vector.load %arg4[%c0_10, %c0_11] : memref<32x1xf32, #tpu.memory_space<vmem>>, vector<32x1xf32>
    %16 = vector.broadcast %15 : vector<32x1xf32> to vector<32x132xf32>
    %17 = arith.addf %14, %16 : vector<32x132xf32>
    %cst_12 = arith.constant 0.000000e+00 : f32
    %18 = vector.broadcast %cst_12 : f32 to vector<32x132xf32>
    %19 = arith.maximumf %17, %18 : vector<32x132xf32>
    %20 = tpu.iota {dimensions = array<i32: 1>} : vector<32x132xi32>
    %c4_i32 = arith.constant 4 : i32
    %21 = vector.broadcast %c4_i32 : i32 to vector<32x132xi32>
    %22 = arith.cmpi slt, %20, %21 : vector<32x132xi32>
    %23 = vector.broadcast %0 : i1 to vector<32x132xi1>
    %24 = arith.andi %23, %22 : vector<32x132xi1>
    %cst_13 = arith.constant 0.000000e+00 : f32
    %25 = vector.broadcast %cst_13 : f32 to vector<32x132xf32>
    %26 = arith.select %24, %25, %19 : vector<32x132xi1>, vector<32x132xf32>
    %27 = arith.truncf %26 : vector<32x132xf32> to vector<32x132xbf16>
    %28 = vector.extract_strided_slice %27 {offsets = [0, 0], sizes = [32, 128], strides = [1, 1]} : vector<32x132xbf16> to vector<32x128xbf16>
    %29 = vector.extract_strided_slice %27 {offsets = [0, 2], sizes = [32, 128], strides = [1, 1]} : vector<32x132xbf16> to vector<32x128xbf16>
    %30 = vector.extract_strided_slice %27 {offsets = [0, 4], sizes = [32, 128], strides = [1, 1]} : vector<32x132xbf16> to vector<32x128xbf16>
    %31 = tpu.concatenate %28, %29, %30 in 0 : vector<32x128xbf16>, vector<32x128xbf16>, vector<32x128xbf16> -> vector<96x128xbf16>
    %c0_14 = arith.constant 0 : index
    %c0_15 = arith.constant 0 : index
    %32 = vector.load %arg5[%c0_14, %c0_15] : memref<32x96xbf16, #tpu.memory_space<vmem>>, vector<32x96xbf16>
    %cst_16 = arith.constant dense<0.000000e+00> : vector<32x128xf32>
    %33 = tpu.matmul %32, %31, %cst_16 {dimension_numbers = #tpu.dot_dimension_numbers<[1], [0], [0], [1], [0, 0, 1, 1], [], []>} : vector<32x96xbf16>, vector<96x128xbf16>, vector<32x128xf32> -> vector<32x128xf32>
    %c0_17 = arith.constant 0 : index
    %c0_18 = arith.constant 0 : index
    %34 = vector.load %arg6[%c0_17, %c0_18] : memref<32x1xf32, #tpu.memory_space<vmem>>, vector<32x1xf32>
    %35 = vector.broadcast %34 : vector<32x1xf32> to vector<32x128xf32>
    %36 = arith.addf %33, %35 : vector<32x128xf32>
    %cst_19 = arith.constant 0.000000e+00 : f32
    %37 = vector.broadcast %cst_19 : f32 to vector<32x128xf32>
    %38 = arith.maximumf %36, %37 : vector<32x128xf32>
    %c0_20 = arith.constant 0 : index
    %c0_21 = arith.constant 0 : index
    %39 = vector.load %arg7[%c0_20, %c0_21] : memref<32x16xbf16, #tpu.memory_space<vmem>>, vector<32x16xbf16>
    %cst_22 = arith.constant dense<0.000000e+00> : vector<32x128xf32>
    %40 = tpu.matmul %39, %2, %cst_22 {dimension_numbers = #tpu.dot_dimension_numbers<[1], [0], [0], [1], [0, 0, 1, 1], [], []>} : vector<32x16xbf16>, vector<16x128xbf16>, vector<32x128xf32> -> vector<32x128xf32>
    %c0_23 = arith.constant 0 : index
    %c0_24 = arith.constant 0 : index
    %41 = vector.load %arg8[%c0_23, %c0_24] : memref<32x1xf32, #tpu.memory_space<vmem>>, vector<32x1xf32>
    %42 = vector.broadcast %41 : vector<32x1xf32> to vector<32x128xf32>
    %43 = arith.addf %40, %42 : vector<32x128xf32>
    %44 = arith.addf %38, %43 : vector<32x128xf32>
    %cst_25 = arith.constant 0.000000e+00 : f32
    %45 = vector.broadcast %cst_25 : f32 to vector<32x128xf32>
    %46 = arith.maximumf %44, %45 : vector<32x128xf32>
    %c0_26 = arith.constant 0 : index
    %c0_27 = arith.constant 0 : index
    %c0_28 = arith.constant 0 : index
    %47 = vector.load %arg9[%c0_26, %c0_27, %c0_28] : memref<1x32x128xf32, #tpu.memory_space<vmem>>, vector<1x32x128xf32>
    %48 = vector.shape_cast %47 : vector<1x32x128xf32> to vector<32x128xf32>
    %49 = vector.shape_cast %46 : vector<32x128xf32> to vector<1x32x128xf32>
    tpu.vector_store %arg9[%c0_26, %c0_27, %c0_28], %49 {strides = array<i32>} : memref<1x32x128xf32, #tpu.memory_space<vmem>>, vector<1x32x128xf32>,
    return
  }
  func.func @transform_0(%arg0: i32, %arg1: i32) -> (i32, i32, i32) {
    %c0_i32 = arith.constant 0 : i32
    %c0_i32_0 = arith.constant 0 : i32
    return %arg0, %c0_i32, %arg1 : i32, i32, i32
  }
  func.func @transform_1(%arg0: i32, %arg1: i32) -> (i32, i32) {
    %c0_i32 = arith.constant 0 : i32
    %c0_i32_0 = arith.constant 0 : i32
    %c0_i32_1 = arith.constant 0 : i32
    return %c0_i32, %c0_i32_0 : i32, i32
  }
  func.func @transform_2(%arg0: i32, %arg1: i32) -> (i32, i32) {
    %c0_i32 = arith.constant 0 : i32
    %c0_i32_0 = arith.constant 0 : i32
    %c0_i32_1 = arith.constant 0 : i32
    return %c0_i32, %c0_i32_0 : i32, i32
  }
  func.func @transform_3(%arg0: i32, %arg1: i32) -> (i32, i32) {
    %c0_i32 = arith.constant 0 : i32
    %c0_i32_0 = arith.constant 0 : i32
    %c0_i32_1 = arith.constant 0 : i32
    return %c0_i32, %c0_i32_0 : i32, i32
  }
  func.func @transform_4(%arg0: i32, %arg1: i32) -> (i32, i32) {
    %c0_i32 = arith.constant 0 : i32
    %c0_i32_0 = arith.constant 0 : i32
    %c0_i32_1 = arith.constant 0 : i32
    return %c0_i32, %c0_i32_0 : i32, i32
  }
  func.func @transform_5(%arg0: i32, %arg1: i32) -> (i32, i32) {
    %c0_i32 = arith.constant 0 : i32
    %c0_i32_0 = arith.constant 0 : i32
    %c0_i32_1 = arith.constant 0 : i32
    return %c0_i32, %c0_i32_0 : i32, i32
  }
  func.func @transform_6(%arg0: i32, %arg1: i32) -> (i32, i32) {
    %c0_i32 = arith.constant 0 : i32
    %c0_i32_0 = arith.constant 0 : i32
    %c0_i32_1 = arith.constant 0 : i32
    return %c0_i32, %c0_i32_0 : i32, i32
  }
  func.func @transform_7(%arg0: i32, %arg1: i32) -> (i32, i32, i32) {
    %c0_i32 = arith.constant 0 : i32
    %c0_i32_0 = arith.constant 0 : i32
    return %arg0, %c0_i32, %arg1 : i32, i32, i32
  }
}

</mosaic_0001>

<bundles_post_ra>
// kernel: tpu_custom_call.1
= control target key start
LH: loop header
LB: loop body
LE: loop exit
PB: predicated region body
PF: predicated region fallthrough
CT: control target
= control target key end

     0   :  { %12 = vsyncpa [#allocation5], 0  ;;  %s1407_s0 = inlined_call_operand.vmem [shape: bf16[2,16,256], index: 0, kind: input, shape index: {}]   ;;  %s1408_s1 = inlined_call_operand.vmem [shape: bf16[32,48], index: 1, kind: input, shape index: {}]   ;;  %s1409_s2 = inlined_call_operand.vmem [shape: f32[32,1], index: 2, kind: input, shape index: {}]   ;;  %s1410_s3 = inlined_call_operand.vmem [shape: bf16[32,96], index: 3, kind: input, shape index: {}]   ;;  %s1411_s4 = inlined_call_operand.vmem [shape: f32[32,1], index: 4, kind: input, shape index: {}]   ;;  %s1412_s5 = inlined_call_operand.vmem [shape: bf16[32,16], index: 5, kind: input, shape index: {}]   ;;  %s1413_s6 = inlined_call_operand.vmem [shape: f32[32,1], index: 6, kind: input, shape index: {}]   ;;  %s1414_s7 = inlined_call_operand.hbm [shape: f32[2,32,256], index: 7, kind: output, shape index: {}]  }
   0x1   :  { %14 = vsyncpa [#allocation5 + $0x1], 0  ;;  %s1143_s24 = smov 0   ;;  %s1145_s25 = smov 0  }
   0x2   :  { %s1147_s26 = smov 0   ;;  %s1149_s27 = smov 0  }
   0x3   :  { %s1151_s28 = smov 0   ;;  %s1153_s29 = smov 0  }
   0x4   :  { %s1155_s30 = smov 0   ;;  %s1157_s8 = smov 0  }
   0x5 LB: > { %s841_s9 = sadd.s32 4294967295, %s1093_s8   ;;  %s842_s10 = sadd.s32 4294967294, %s1093_s8   ;;  %s1093_s8 = sphi %s1157_s8, %s20_s8   ;;  %s1089_s30 = sphi %s1155_s30, %s1436_s30   ;;  %s1085_s29 = sphi %s1153_s29, %s1435_s29   ;;  %s1081_s28 = sphi %s1151_s28, %s1434_s28   ;;  %s1077_s27 = sphi %s1149_s27, %s1433_s27   ;;  %s1073_s26 = sphi %s1147_s26, %s1432_s26   ;;  %s1069_s25 = sphi %s1145_s25, %s1431_s25   ;;  %s1065_s24 = sphi %s1143_s24, %s1430_s24  }
   0x6   : > { %s29_s11 = sadd.s32 1, %s1085_s29  ;;  %s32_s12 = sadd.s32 1, %s1089_s30 }
   0x7   : > { %p30_p0 = scmp.ge.s32.totalorder %s29_s11, 2  ;;  %p48_p1 = scmp.ne.s32.totalorder %s1073_s26, %s1069_s25 }
   0x8   : > { %p49_p2 = scmp.eq.s32.totalorder %s1093_s8, 0  ;;  %p206_p5 = scmp.eq.s32.totalorder %s841_s9, 3 }
   0x9   : > { %s1438_s11 = smov (%p30_p0, %s29_s11), 0  ;;  %s1440_s12 = smov (!%p30_p0, %s32_s12), %s1089_s30 }
   0xa   : > { %s37_s13 = ssub.s32 %s1085_s29, %s1438_s11  ;;  %p1195_p3 = por %p49_p2, %p48_p1 }
   0xb   : > { %p34_p4 = scmp.ge.s32.totalorder %s1440_s12, 2  ;;  %p211_p6 = scmp.ne.s32.totalorder %s1069_s25, %s1065_s24 }
   0xc   : > { %p212_p7 = scmp.eq.s32.totalorder %s842_s10, 3  ;;  %p1203_p8 = por %p206_p5, %p48_p1 }
   0xd   : > { %s1442_s12 = smov (%p34_p4, %s1440_s12), 0  ;;  %s41_s19 = sadd.s32 1, %s1073_s26 }
   0xe   : > { %1420 = sst [smem:[#allocation7_spill]] %s1442_s12  ;;  %p1207_p9 = por %p212_p7, %p211_p6 }
   0xf   : > { %s36_s17 = ssub.s32 %s1089_s30, %s1442_s12  ;;  %p844_p11 = scmp.ge.s32.totalorder %s1093_s8, 4 }
  0x10   : > { %s38_s18 = sor.u32 %s37_s13, %s36_s17 }
  0x11   : > { %p39_p10 = scmp.eq.s32.totalorder %s38_s18, 0  ;;  %246 = sbr.rel (%p844_p11) target bundleno = 31 (0x1f), region = 40 }
  0x13   : > { %s1215_s20 = scalar_select %p39_p10, %s1073_s26, %s41_s19  }
  0x18   : > { %249 = sbr.rel (!%p1195_p3) target bundleno = 31 (0x1f), region = 44  ;;  %s251_s21 = sand.u32 (%p1195_p3), 1, %s1073_s26  }
  0x19   : > { %s846_s22 = sshll.u32 (%p1195_p3), %s1089_s30, 2  ;;  %s845_s23 = sshll.u32 (%p1195_p3), %s251_s21, 3 }
  0x1a   : > { %s255_s9 = sadd.s32 (%p1195_p3), %s1085_s29, %s846_s22  ;;  %s253_s18 = scalar_lea.vmem (%p1195_p3), [#allocation3], %s845_s23 }
  0x1b   : > { %s847_s10 = sshll.u32 (%p1195_p3), %s255_s9, 2 }
  0x1c   : > { %s257_s17 = scalar_lea.vmem (%p1195_p3), %s1407_s0, %s847_s10 }
  0x1d   : > { %v273_v0 = vld [vmem:[%s257_s17] sm:$0xf] (%p1195_p3)  ;;  %v275_v1 = vld [vmem:[%s257_s17 + $0x8] sm:$0xf] (%p1195_p3) }
  0x1e   : > { %274 = vst [vmem:[%s253_s18] sm:$0xf] (%p1195_p3), %v273_v0  ;;  %276 = vst [vmem:[%s253_s18 + $0x4] sm:$0xf] (%p1195_p3), %v275_v1 }
  0x1f PF: > { %p848_p12 = scmp.ge.s32.totalorder %s1093_s8, 1  ;;  %p302_p13 = scmp.lt.s32.totalorder %s1093_s8, 5 }
  0x21   : > { %p303_p0 = pnand %p848_p12, %p302_p13 }
  0x22   : > { %s1229_s14 = sand.u32 (!%p303_p0), 1, %s1069_s25   ;;  %p341_p1 = scmp.eq.s32.totalorder (!%p303_p0), %s1077_s27, 0 }
  0x23   : > { %306 = sbr.rel (%p303_p0) target bundleno = 895 (0x37f), region = 85  ;;  %s849_s12 = sshll.u32 (!%p303_p0), %s1229_s14, 3 }
  0x24   : > { %s850_s19 = sshll.u32 (!%p303_p0), %s1229_s14, 5  ;;  %s311_s21 = scalar_lea.vmem (!%p303_p0), [#allocation3], %s849_s12 }
  0x25   : > { %v342_v2 = vld [vmem:[%s311_s21] sm:$0xf] (!%p303_p0)  ;;  %v343_v3 = vld [vmem:[%s311_s21 + $0x4] sm:$0xf] (!%p303_p0)  ;;  %s1234_s22 = scalar_lea.vmem (!%p303_p0), [#allocation4], %s850_s19  ;;  %p851_p2 = scmp.ne.s32.totalorder (!%p303_p0), %s1077_s27, 0 }
  0x2a   : > { %346 = sbr.rel (%p851_p2) target bundleno = 49 (0x31), region = 93  ;;  %vm347_vm0 = vcmask (!%p851_p2), 64512   ;;  %v1095_v4 = vmov (!%p851_p2), 0  }
  0x2b   : > { %348 = vst.msk [vmem:[#allocation2] sm:$0xff] (!%p851_p2), %vm347_vm0, %v1095_v4 }
  0x31 PF: > { %v852_v5 = vcombine.low %v342_v2, %v343_v3  ;;  %s1416_s23 = smov 8   ;;  %vm357_vm1 = vcmask 1047616   ;;  %vm359_vm2 = vcmask 64512   ;;  %v1097_v7 = vmov 0   ;;  %s1417_s9 = smov 126   ;;  %v386_v10 = vld [vmem:[%s1409_s2] sm:$0xff] }
  0x32   : > { %459 = vmatprep.mubr.bf16.mxu0 %v1097_v7  ;;  %991 = vset.pattern.permute.xlu1 %v1097_v7  ;;  %s1099_s10 = smov 124   ;;  %v387_v11 = vld [vmem:[%s1409_s2 + $0x8] sm:$0xff]  ;;  %v388_v12 = vld [vmem:[%s1409_s2 + $0x10] sm:$0xff]  ;;  %v389_v13 = vld [vmem:[%s1409_s2 + $0x18] sm:$0xff]  ;;  %vm370_vm3 = vcmask 1031168   ;;  %vm378_vm4 = vcmask 1014784   ;;  %v488_v24 = vlaneseq }
  0x33   : > { %354 = vrot.lane.b32.xlu0 %v852_v5, %s1416_s23  ;;  %v993_v20 = vld [vmem:[%s1408_s1] sm:$0xff]   ;;  %vm420_vm5 = vcmask 392192   ;;  %v994_v21 = vld [vmem:[%s1408_s1 + $0x8] sm:$0xff]   ;;  %vm675_vm6 = vcmask 130048   ;;  %s493_s13 = scalar_select %p341_p1, 1, 0 }
  0x34   : > { %992 = vset.pattern.permute.xlu0 %v1097_v7  ;;  %v995_v22 = vld [vmem:[%s1412_s5] sm:$0xff]   ;;  %v996_v23 = vld [vmem:[%s1412_s5 + $0x8] sm:$0xff]   ;;  %v489_v25 = vand.u32 127, %v488_v24  ;;  %s1427_s17 = smov 126   ;;  %vm576_vm12 = vcmask 785408   ;;  %s876_s18 = sshll.u32 %s1081_s28, 3 }
  0x35   : > { %v494_v26 = vstv %s493_s13  ;;  %v997_v3 = vld [vmem:[%s1410_s3] sm:$0xff]   ;;  %v543_v4 = vld [vmem:[%s1411_s4 + $0x8] sm:$0xff]  ;;  %s755_s12 = sadd.s32 %s1077_s27, %s876_s18  ;;  %s758_s19 = sshll.u32 %s1234_s22, 4  ;;  %s1349_s19 = int_to_ptr.vmem [resolvable:$true] %s758_s19 }
  0x36   : > { %vm491_vm7 = vcmp.lt.s32.totalorder %v489_v25, 4  ;;  %vm495_vm8 = vcmp.eq.s32.totalorder %v494_v26, 1  ;;  %903 = vmatprep.mubr.msk.bf16.mxu1 %vm576_vm12, %v997_v3  ;;  %s877_s28 = sshll.u32 %s755_s12, 7  ;;  %s999_s23 = scalar_lea.vmem %s1349_s19, 512 }
  0x37   : > { %vm1270_vm9 = vmand %vm495_vm8, %vm491_vm7  ;;  %s1347_s13 = scalar_lea.hbm %s1414_s7, %s877_s28  ;;  %p1000_p3 = scmp.ne.s32.totalorder %s1349_s19, %s999_s23 }
  0x38   : > { %vm859_vm10 = vmneg %vm1270_vm9 }
  0x39   : > { %vm1276_vm11 = vmpackc.low %vm859_vm10, %vm859_vm10  ;;  %p1001_p4 = pnand %p1000_p3, %p1203_p8 }
  0x3b   : > { %p1002_p5 = pneg %p1001_p4 }
  0xa5   : > { %v355_v6 = vpop.permute.xlu0 %354 }
  0xa6   : > { %358 = vst.msk [vmem:[#allocation2] sm:$0xff] %vm357_vm1, %v355_v6 }
  0xa7   : > { %360 = vst.msk [vmem:[#allocation2 + $0x8] sm:$0xff] %vm359_vm2, %v355_v6  ;;  %v545_v6 = vld [vmem:[%s1411_s4 + $0x18] sm:$0xff] }
  0xad   : > { %v361_v9 = vld [vmem:[#allocation2] sm:$0xff] }
  0xae   : > { %v362_v8 = vld [vmem:[#allocation2 + $0x8] sm:$0xff]  ;;  %366 = vrot.lane.b32.xlu0 %v361_v9, %s1417_s9 }
  0xaf   : > { %368 = vrot.lane.b32.xlu1 %v362_v8, %s1417_s9  ;;  %427 = vmatprep.subr.bf16.mxu0 %v362_v8  ;;  %363 = vst.msk [vmem:[#allocation2] sm:$0xff] %vm359_vm2, %v362_v8  ;;  %s1100_s9 = smov [#allocation4]  }
  0xb0   : > { %428 = vmatpush1.bf16.msra.mxu0 %v361_v9 }
  0xb2   : > { %376 = vrot.lane.b32.xlu0 %v362_v8, %s1099_s10 }
  0xb3   : > { %374 = vrot.lane.b32.xlu1 %v361_v9, %s1099_s10  ;;  %v641_v9 = vld [vmem:[%s1413_s6 + $0x8] sm:$0xff] }
  0xb6   : > { %397 = vperm.xlu0 %992, %v387_v11   ;;  %v640_v11 = vld [vmem:[%s1413_s6] sm:$0xff] }
  0xb7   : > { %392 = vperm.xlu1 %991, %v386_v10  }
  0xbb   : > { %402 = vperm.xlu1 %991, %v388_v12  }
  0xbf   : > { %407 = vperm.xlu1 %991, %v389_v13  }
 0x120   : > { %v367_v15 = vpop.permute.xlu0 %366 }
 0x121   : > { %v369_v14 = vpop.permute.xlu1 %368 }
 0x122   : > { %429 = vmatprep.subr.bf16.mxu0 %v369_v14  ;;  %v371_v16 = vsel %vm370_vm3, %v367_v15, %v369_v14  ;;  %v643_v14 = vld [vmem:[%s1413_s6 + $0x18] sm:$0xff]  ;;  %v642_v15 = vld [vmem:[%s1413_s6 + $0x10] sm:$0xff] }
 0x123   : > { %430 = vmatpush1.bf16.msra.mxu0 %v371_v16 }
 0x124   : > { %v377_v18 = vpop.permute.xlu0 %376 }
 0x125   : > { %v375_v17 = vpop.permute.xlu1 %374  ;;  %431 = vmatprep.subr.bf16.mxu0 %v377_v18 }
 0x126   : > { %v379_v19 = vsel %vm378_vm4, %v375_v17, %v377_v18 }
 0x127   : > { %432 = vmatpush1.bf16.msra.mxu0 %v379_v19 }
 0x128   : > { %907 = vmatprep.subr.bf16.mxu0 %v852_v5 }
 0x12a   : > { %855 = vmatmul.mubr.msk.bf16.vlgmr.msra.gmra.mrb[0].mxu0 %vm420_vm5, %v993_v20 }
 0x12b   : > { %469 = vmatprep.mubr.bf16.mxu0 %v1097_v7  ;;  %908 = vmatpush3.bf16.msra.mxu0 %v852_v5  ;;  %v542_v5 = vld [vmem:[%s1411_s4] sm:$0xff]  ;;  %v544_v7 = vld [vmem:[%s1411_s4 + $0x10] sm:$0xff] }
 0x132   : > { %856 = vmatmul.mubr.msk.bf16.gmra.mrb[4].mxu0 %vm420_vm5, %v994_v21 }
 0x133   : > { %909 = vmatprep.mubr.msk.bf16.mxu0 %vm675_vm6, %v995_v22 }
 0x135   : > { %v398_v29 = vpop.permute.xlu0 %397 }
 0x136   : > { %v393_v27 = vpop.permute.xlu1 %392 }
 0x13a   : > { %910 = vmatmul.mubr.msk.bf16.vlgmr.msra.gmra.mrb[8].mxu0 %vm675_vm6, %v996_v23  ;;  %v403_v38 = vpop.permute.xlu1 %402 }
 0x13e   : > { %v408_v52 = vpop.permute.xlu1 %407 }
 0x1fd   : > { %v461_v28 = vpop.f32.mrb[0].mxu0 }
 0x1fe   : > { %v462_v30 = vadd.f32 %v461_v28, %v393_v27  ;;  %v463_v31 = vpop.f32.mrb[1].mxu0  ;;  %v998_v28 = vld [vmem:[%s1410_s3 + $0x8] sm:$0xff]  }
 0x1ff   : > { %v464_v33 = vadd.f32 %v463_v31, %v393_v27  ;;  %v465_v34 = vpop.f32.mrb[2].mxu0 }
 0x200   : > { %v480_v35 = vmax.f32 %v462_v30, 0.0  ;;  %v466_v36 = vadd.f32 %v465_v34, %v398_v29  ;;  %v467_v37 = vpop.f32.mrb[3].mxu0 }
 0x201   : > { %v468_v39 = vadd.f32 %v467_v37, %v398_v29  ;;  %v481_v41 = vmax.f32 %v464_v33, 0.0 }
 0x202   : > { %v482_v40 = vmax.f32 %v466_v36, 0.0  ;;  %v498_v44 = vsel %vm1270_vm9, 0.0, %v480_v35 }
 0x203   : > { %v483_v42 = vmax.f32 %v468_v39, 0.0 }
 0x204   : > { %v500_v45 = vsel %vm1270_vm9, 0.0, %v482_v40  ;;  %v862_v46 = vpack.c.bf16 %v482_v40, %v480_v35 }
 0x205   : > { %v507_v47 = vpack.c.bf16 %v483_v42, %v481_v41  ;;  %v471_v48 = vpop.f32.mrb[4].mxu0  ;;  %v506_v49 = vpack.c.bf16 %v500_v45, %v498_v44 }
 0x206   : > { %v472_v50 = vadd.f32 %v471_v48, %v403_v38  ;;  %v473_v51 = vpop.f32.mrb[5].mxu0  ;;  %891 = vmatprep.subr.msk.bf16.mxu1 %vm1276_vm11, %v862_v46 }
 0x207   : > { %v474_v53 = vadd.f32 %v473_v51, %v403_v38  ;;  %v475_v54 = vpop.f32.mrb[6].mxu0  ;;  %516 = vrot.lane.b32.xlu1 %v507_v47, %s1427_s17  ;;  %892 = vmatpush3.bf16.msk.msra.mxu1 %vm1276_vm11, %v862_v46 }
 0x208   : > { %v484_v55 = vmax.f32 %v472_v50, 0.0  ;;  %v476_v56 = vadd.f32 %v475_v54, %v408_v52  ;;  %514 = vrot.lane.b32.xlu0 %v506_v49, %s1427_s17  ;;  %v477_v57 = vpop.f32.mrb[7].mxu0 }
 0x209   : > { %v478_v58 = vadd.f32 %v477_v57, %v408_v52  ;;  %v485_v60 = vmax.f32 %v474_v53, 0.0 }
 0x20a   : > { %v486_v59 = vmax.f32 %v476_v56, 0.0  ;;  %v502_v62 = vsel %vm1270_vm9, 0.0, %v484_v55 }
 0x20b   : > { %v487_v61 = vmax.f32 %v478_v58, 0.0 }
 0x20c   : > { %v504_v63 = vsel %vm1270_vm9, 0.0, %v486_v59  ;;  %v867_v0 = vpack.c.bf16 %v486_v59, %v484_v55 }
 0x20d   : > { %v509_v1 = vpack.c.bf16 %v487_v61, %v485_v60  ;;  %v508_v2 = vpack.c.bf16 %v504_v63, %v502_v62  ;;  %v911_v8 = vpop.f32.mrb[8].mxu0 }
 0x20e   : > { %893 = vmatprep.subr.msk.bf16.mxu1 %vm1276_vm11, %v867_v0  ;;  %v716_v10 = vpop.f32.mrb[9].mxu0 }
 0x20f   : > { %520 = vrot.lane.b32.xlu1 %v509_v1, %s1427_s17  ;;  %894 = vmatpush3.bf16.msk.msra.mxu1 %vm1276_vm11, %v867_v0  ;;  %v912_v12 = vpop.f32.mrb[10].mxu0 }
 0x210   : > { %518 = vrot.lane.b32.xlu0 %v508_v2, %s1427_s17  ;;  %v719_v13 = vpop.f32.mrb[11].mxu0  ;;  %s744_s17 = scalar_lea.sflag [#allocation5], %s1229_s14 }
 0x213   : > { %528 = vrot.lane.b32.xlu1 %v507_v47, %s1099_s10 }
 0x214   : > { %526 = vrot.lane.b32.xlu0 %v506_v49, %s1099_s10 }
 0x217   : > { %532 = vrot.lane.b32.xlu1 %v509_v1, %s1099_s10 }
 0x218   : > { %530 = vrot.lane.b32.xlu0 %v508_v2, %s1099_s10  ;;  %s1003_s10 = sshll.u32 %s1100_s9, 4  ;;  %s1004_s10 = int_to_ptr.vmem [resolvable:$false] %s1003_s10 }
 0x219   : > { %s1005_s18 = scalar_lea.vmem %s1004_s10, 1024  ;;  %p1006_p6 = scmp.lt.s32.totalorder %s1349_s19, %s1004_s10 }
 0x21a   : > { %p1007_p7 = scmp.lt.s32.totalorder %s1005_s18, %s999_s23 }
 0x21b   : > { %553 = vperm.xlu1 %991, %v543_v4  }
 0x21c   : > { %548 = vperm.xlu0 %992, %v542_v5   ;;  %p1008_p10 = por %p1007_p7, %p1006_p6 }
 0x21e   : > { %p1009_p11 = pnand %p1008_p10, %p1002_p5 }
 0x21f   : > { %563 = vperm.xlu1 %991, %v545_v6  }
 0x220   : > { %558 = vperm.xlu0 %992, %v544_v7  }
 0x223   : > { %651 = vperm.xlu1 %991, %v641_v9  }
 0x224   : > { %646 = vperm.xlu0 %992, %v640_v11  }
 0x227   : > { %661 = vperm.xlu1 %991, %v643_v14  }
 0x228   : > { %656 = vperm.xlu0 %992, %v642_v15  }
 0x279   : > { %v517_v16 = vpop.permute.xlu1 %516 }
 0x27a   : > { %v515_v17 = vpop.permute.xlu0 %514 }
 0x27b   : > { %v522_v18 = vsel %vm370_vm3, %v515_v17, %v517_v16 }
 0x27c   : > { %895 = vmatprep.subr.bf16.mxu1 %v522_v18 }
 0x27d   : > { %896 = vmatpush3.bf16.msra.mxu1 %v522_v18 }
 0x281   : > { %v521_v19 = vpop.permute.xlu1 %520 }
 0x282   : > { %v519_v20 = vpop.permute.xlu0 %518 }
 0x283   : > { %v523_v21 = vsel %vm370_vm3, %v519_v20, %v521_v19 }
 0x284   : > { %897 = vmatprep.subr.bf16.mxu1 %v523_v21 }
 0x285   : > { %898 = vmatpush3.bf16.msra.mxu1 %v523_v21  ;;  %v529_v22 = vpop.permute.xlu1 %528 }
 0x286   : > { %v527_v23 = vpop.permute.xlu0 %526 }
 0x287   : > { %v534_v24 = vsel %vm378_vm4, %v527_v23, %v529_v22 }
 0x288   : > { %899 = vmatprep.subr.bf16.mxu1 %v534_v24 }
 0x289   : > { %900 = vmatpush3.bf16.msra.mxu1 %v534_v24  ;;  %v533_v25 = vpop.permute.xlu1 %532 }
 0x28a   : > { %v531_v26 = vpop.permute.xlu0 %530 }
 0x28b   : > { %v535_v27 = vsel %vm378_vm4, %v531_v26, %v533_v25 }
 0x28c   : > { %901 = vmatprep.subr.bf16.mxu1 %v535_v27 }
 0x28d   : > { %902 = vmatpush3.bf16.msra.mxu1 %v535_v27 }
 0x290   : > { %904 = vmatmul.mubr.msk.bf16.vlgmr.msra.gmra.mrb[0].mxu1 %vm576_vm12, %v998_v28 }
 0x29a   : > { %v554_v30 = vpop.permute.xlu1 %553 }
 0x29b   : > { %v549_v29 = vpop.permute.xlu0 %548 }
 0x29e   : > { %v564_v32 = vpop.permute.xlu1 %563 }
 0x29f   : > { %v559_v31 = vpop.permute.xlu0 %558 }
 0x2a2   : > { %v652_v34 = vpop.permute.xlu1 %651 }
 0x2a3   : > { %v647_v33 = vpop.permute.xlu0 %646  ;;  %v720_v52 = vadd.f32 %v719_v13, %v652_v34 }
 0x2a4   : > { %v717_v46 = vadd.f32 %v716_v10, %v647_v33 }
 0x2a6   : > { %v662_v39 = vpop.permute.xlu1 %661 }
 0x2a7   : > { %v657_v35 = vpop.permute.xlu0 %656  ;;  %v728_v49 = vadd.f32 %v912_v12, %v662_v39 }
 0x2a8   : > { %v725_v42 = vadd.f32 %v911_v8, %v657_v35 }
 0x363   : > { %v905_v36 = vpop.f32.mrb[0].mxu1 }
 0x364   : > { %v626_v37 = vadd.f32 %v905_v36, %v559_v31  ;;  %v617_v38 = vpop.f32.mrb[1].mxu1 }
 0x365   : > { %v618_v40 = vadd.f32 %v617_v38, %v549_v29  ;;  %v906_v41 = vpop.f32.mrb[2].mxu1 }
 0x366   : > { %v634_v43 = vmax.f32 %v626_v37, 0.0  ;;  %v629_v44 = vadd.f32 %v906_v41, %v564_v32  ;;  %v620_v45 = vpop.f32.mrb[3].mxu1 }
 0x367   : > { %v632_v47 = vmax.f32 %v618_v40, 0.0  ;;  %v621_v48 = vadd.f32 %v620_v45, %v554_v30 }
 0x368   : > { %v733_v50 = vadd.f32 %v725_v42, %v634_v43  ;;  %v635_v51 = vmax.f32 %v629_v44, 0.0 }
 0x369   : > { %v731_v53 = vadd.f32 %v717_v46, %v632_v47  ;;  %v633_v54 = vmax.f32 %v621_v48, 0.0 }
 0x36a   : > { %v737_v55 = vmax.f32 %v733_v50, 0.0  ;;  %v734_v56 = vadd.f32 %v728_v49, %v635_v51 }
 0x36b   : > { %v735_v57 = vmax.f32 %v731_v53, 0.0  ;;  %v732_v58 = vadd.f32 %v720_v52, %v633_v54 }
 0x36c   : > { %741 = vst [vmem:[%s1234_s22 + $0x10] sm:$0xff] %v737_v55  ;;  %v738_v59 = vmax.f32 %v734_v56, 0.0 }
 0x36d   : > { %739 = vst [vmem:[%s1234_s22] sm:$0xff] %v735_v57  ;;  %v736_v60 = vmax.f32 %v732_v58, 0.0 }
 0x36e   : > { %742 = vst [vmem:[%s1234_s22 + $0x18] sm:$0xff] %v738_v59 }
 0x36f   : > { %740 = vst [vmem:[%s1234_s22 + $0x8] sm:$0xff] %v736_v60 }
 0x370   : > { %1012 = shalt.err (!%p1009_p11)
}
 0x371   : > { %s1013_s22 = scalar_lea.hbm %s1347_s13, 512  ;;  %s1017_s27 = scalar_lea.hbm %s1414_s7, 2048 }
 0x372   : > { %p1014_p12 = scmp.ne.s32.totalorder %s1347_s13, %s1013_s22  ;;  %p1018_p1 = scmp.lt.u32.totalorder %s1347_s13, %s1414_s7 }
 0x373   : > { %p1019_p2 = scmp.lt.u32.totalorder %s1017_s27, %s1013_s22  ;;  %p1021_p4 = scmp.lt.u32.totalorder %s1013_s22, %s1347_s13 }
 0x374   : > { %p1015_p13 = pnand %p1014_p12, %p1203_p8 }
 0x375   : > { %p1020_p3 = por %p1019_p2, %p1018_p1 }
 0x376   : > { %p1016_p0 = pneg %p1015_p13 }
 0x377   : > { %p1022_p5 = por %p1021_p4, %p1020_p3 }
 0x379   : > { %p1023_p6 = pnand %p1022_p5, %p1016_p0 }
 0x37b   : > { %1026 = shalt.err (!%p1023_p6)
}
 0x37c   : > { %s1101_s23 = smov 128   ;;  %s1102_s10 = smov 256  }
 0x37d   : > { %s1428_s18 = smov 8  }
 0x37e   : > { %913 = dma.vmem_to_hbm [thread:$0]  (%p1203_p8), %s1349_s19, 512, %s1347_s13, %s744_s17, %s1101_s23, %s1102_s10, %s1428_s18  }
 0x37f PF: > { %p919_p7 = scmp.ge.s32.totalorder %s1093_s8, 2  ;;  %s773_s12 = sand.u32 1, %s1065_s24  }
 0x380   : > { %s774_s22 = scalar_lea.sflag [#allocation5], %s773_s12 }
 0x381   : > { %p916_p10 = pnand %p919_p7, %p1207_p9 }
 0x383   : > { %1060 = dma.done.wait (!%p916_p10), %s774_s22, 512  }
 0x384   : > { %1062 = vsyncadd (!%p916_p10), %s774_s22, 4294966784  ;;  %s20_s8 = sadd.s32 1, %s1093_s8   ;;  %s1429_s15 = sld [smem:[#allocation7_spill]] }
 0x385   : > { %p17_p11 = scmp.ge.s32.totalorder %s20_s8, 6   ;;  %s1430_s24 = smov %s1069_s25 }
 0x386   : > { %s1431_s25 = smov %s1073_s26  ;;  %s1432_s26 = smov %s1215_s20 }
 0x387   : > { %s1433_s27 = smov %s1085_s29  ;;  %s1434_s28 = smov %s1089_s30 }
 0x388   : > { %s1435_s29 = smov %s1438_s11  ;;  %19 = sbr.rel (!%p17_p11) target bundleno = 5 (0x5), region = 133 }
 0x38a   : > { %s1436_s30 = smov %s1429_s15 }
 0x38f   :  { %779 = vsyncpa [#allocation5], 1 }
 0x390   :  { %781 = vsyncpa [#allocation5 + $0x1], 1 }

</bundles_post_ra>
